<compile_context>
chip_gen: v6e
topology: v6e:2x2x1
jax: 0.10.0
libtpu: 0.0.40
codegen_flags: <defaults>
</compile_context>

<pallas_src>
import functools
import math

import jax
import jax.numpy as jnp
from jax.experimental import pallas as pl
from jax.experimental.pallas import tpu as pltpu

_SMALL_FALLBACK_BYTES = 1 << 20   # below this, a fused XLA elementwise wins


def _cdiv(a, b):
    return -(-a // b)


def _target_tile_bytes():
    # ~1-2 MiB tiles already sit near the roofline knee on v5e/v6e; v7x's
    # 3.2 TB/s needs bigger tiles to amortise the ~0.35 us per-step overhead.
    try:
        kind = jax.devices()[0].device_kind.lower()
    except Exception:
        kind = ""
    return (4 << 20) if "v7" in kind else (2 << 20)


def _drop_path_kernel(keep_ref, x_ref, o_ref, *, inv_keep_prob):
    # keep_ref: SMEM (B,) int32 per-sample keep flag (scalar-prefetched)
    # x_ref / o_ref: VMEM (1, tblk, lanes) tile of sample b
    b = pl.program_id(0)
    keep = keep_ref[b]

    @pl.when(keep == 0)
    def _():
        # Dropped sample: write zeros.  Its input tile is never re-fetched
        # (index_map pins it to block (b, 0, 0)).
        o_ref[...] = jnp.zeros_like(o_ref)

    @pl.when(keep != 0)
    def _():
        o_ref[...] = x_ref[...] * jnp.asarray(inv_keep_prob, dtype=o_ref.dtype)


def drop_path_pallas(x, rand_u, drop_prob: float, training: bool):
    """DropPath forward. `rand_u` is a (B,) float32 array of U[0,1) draws
    (stands in for torch.rand; generated in the wrapper, consumed in-kernel)."""
    if drop_prob == 0.0 or not training:
        return x

    keep_prob = 1.0 - drop_prob
    B = x.shape[0]
    if rand_u.shape != (B,):
        raise ValueError(f"rand_u must have shape ({B},), got {rand_u.shape}")

    orig_shape = x.shape
    F = math.prod(x.shape[1:])
    itemsize = x.dtype.itemsize

    # Per-sample keep mask: floor(keep_prob + u) in {0, 1}.
    mask = jnp.floor(keep_prob + rand_u.astype(jnp.float32))

    # Small tensors: the reshape / kernel-dispatch chain dwarfs the op.
    if B * F * itemsize < _SMALL_FALLBACK_BYTES:
        scale = (mask * jnp.float32(1.0 / keep_prob)).astype(x.dtype)
        return x * scale.reshape((B,) + (1,) * (x.ndim - 1))

    # Lane width: largest of {512, 256, 128} dividing F -> no pad / slice.
    lanes = None
    for cand in (512, 256, 128):
        if F % cand == 0:
            lanes = cand
            break
    xf = x.reshape(B, F)
    if lanes is None:
        # F not a multiple of 128: pad (<= 511 elems per sample).
        lanes = 512
        f_pad = _cdiv(F, lanes) * lanes
        xf = jnp.pad(xf, ((0, 0), (0, f_pad - F)))
    else:
        f_pad = F
    T = f_pad // lanes
    x3 = xf.reshape(B, T, lanes)

    # Row-tile: chip-dependent target bytes, sublane alignment matching dtype
    # packing (8 rows for 4B, 16 for 2B, 32 for 1B dtypes).
    sub = 8 * max(1, 4 // itemsize)
    tblk = max(sub, (_target_tile_bytes() // (lanes * itemsize)) // sub * sub)
    tblk = min(T, tblk)
    # Keep enough grid steps for the double-buffered pipeline (and the two
    # v7x TensorCores) to reach steady state; ragged last block is fine.
    while tblk > sub and B * _cdiv(T, tblk) < 8:
        tblk = max(sub, ((tblk // 2) // sub) * sub)
    nt = _cdiv(T, tblk)

    keep_i32 = mask.astype(jnp.int32)

    def x_index_map(b, t, keep_ref):
        # Dropped sample -> constant block index, so consecutive grid steps
        # skip the re-DMA (saves ~drop_prob of the input read traffic).
        return (b, t * keep_ref[b], 0)

    out3 = pl.pallas_call(
        functools.partial(_drop_path_kernel, inv_keep_prob=1.0 / keep_prob),
        out_shape=jax.ShapeDtypeStruct((B, T, lanes), x.dtype),
        grid_spec=pltpu.PrefetchScalarGridSpec(
            num_scalar_prefetch=1,
            grid=(B, nt),
            in_specs=[pl.BlockSpec((1, tblk, lanes), x_index_map)],
            out_specs=pl.BlockSpec((1, tblk, lanes),
                                   lambda b, t, keep: (b, t, 0)),
        ),
        compiler_params=pltpu.CompilerParams(
            dimension_semantics=("parallel", "parallel")),
    )(keep_i32, x3)

    out = out3.reshape(B, f_pad)
    if f_pad != F:
        out = out[:, :F]
    return out.reshape(orig_shape)


class DropPath:
    """Mirror of the PyTorch module; drop_prob fixed at init, training flag at call."""

    def __init__(self, drop_prob=None):
        self.drop_prob = 0.0 if drop_prob is None else float(drop_prob)

    def __call__(self, x, rand_u, training: bool = True):
        return drop_path_pallas(x, rand_u, self.drop_prob, training)


if __name__ == "__main__":
    key = jax.random.PRNGKey(0)
    kx1, kx2, kx3, kr = jax.random.split(key, 4)

    drop_prob = 0.3
    keep_prob = 1.0 - drop_prob
    module = DropPath(drop_prob)

    def ref_drop_path(x, rand_u):
        m = jnp.floor(keep_prob + rand_u.astype(jnp.float32))
        m = m.reshape((x.shape[0],) + (1,) * (x.ndim - 1))
        return (x.astype(jnp.float32) / keep_prob * m).astype(x.dtype)

    # 1) tiny Swin-like (B, N, C): XLA fast path (kernel skipped on purpose)
    x = jax.random.normal(kx1, (2, 8, 32), dtype=jnp.float32)
    rand_u = jnp.array([0.95, 0.05], dtype=jnp.float32)   # keep / drop
    out = jax.block_until_ready(module(x, rand_u, training=True))
    assert out.shape == x.shape and out.dtype == x.dtype
    assert jnp.allclose(out, ref_drop_path(x, rand_u), atol=1e-6, rtol=1e-5)

    # eval / drop_prob==0 paths are identity (no kernel), matching PyTorch
    assert jnp.array_equal(module(x, rand_u, training=False), x)
    assert jnp.array_equal(DropPath(0.0)(x, rand_u, training=True), x)

    # 2) kernel path: F divisible by 512 (no pad), multi-tile grid + ragged T,
    #    one dropped sample exercises the zero-write / skipped-DMA branch.
    x2 = jax.random.normal(kx2, (2, 520, 512), dtype=jnp.float32)
    rand_u2 = jnp.array([0.05, 0.95], dtype=jnp.float32)   # drop / keep
    out2 = jax.block_until_ready(module(x2, rand_u2, training=True))
    assert jnp.allclose(out2, ref_drop_path(x2, rand_u2), atol=1e-6, rtol=1e-5)

    # 3) kernel path with F % 128 != 0 (pad path), random keep/drop
    x3 = jax.random.normal(kx3, (2, 3000, 70), dtype=jnp.float32)
    rand_u3 = jax.random.uniform(kr, (2,), dtype=jnp.float32)
    out3 = jax.block_until_ready(module(x3, rand_u3, training=True))
    assert jnp.allclose(out3, ref_drop_path(x3, rand_u3), atol=1e-6, rtol=1e-5)

    # 4) bf16 kernel path (dtype-aware sublane alignment)
    x4 = jax.random.normal(kx2, (2, 520, 512), dtype=jnp.bfloat16)
    out4 = jax.block_until_ready(module(x4, rand_u2, training=True))
    assert jnp.allclose(out4.astype(jnp.float32),
                        ref_drop_path(x4, rand_u2).astype(jnp.float32),
                        atol=1e-2, rtol=2e-2)

    print("KERNEL_OK")
</pallas_src>

<mosaic_0001>
module attributes {stable_mosaic.version = 11 : i64} {
  func.func @_drop_path_kernel(%arg0: i32, %arg1: i32, %arg2: memref<2xi32, #tpu.memory_space<smem>>, %arg3: memref<1x128x512xf32, #tpu.memory_space<vmem>>, %arg4: memref<1x128x512xf32, #tpu.memory_space<vmem>>) attributes {dimension_semantics = [#tpu.dimension_semantics<parallel>, #tpu.dimension_semantics<parallel>], iteration_bounds = array<i64: 2, 5>, scalar_prefetch = 1 : i64, scratch_operands = 0 : i64, tpu.core_type = #tpu.core_type<tc>, window_params = [{transform_indices = @transform_0, window_bounds = array<i64: 1, 128, 512>}, {transform_indices = @transform_1, window_bounds = array<i64: 1, 128, 512>}]} {
    %0 = arith.index_cast %arg0 : i32 to index
    %1 = memref.load %arg2[%0] : memref<2xi32, #tpu.memory_space<smem>>
    %c0_i32 = arith.constant 0 : i32
    %2 = arith.cmpi eq, %1, %c0_i32 : i32
    %3 = arith.extui %2 : i1 to i32
    %c0_i32_0 = arith.constant 0 : i32
    %4 = arith.cmpi ne, %3, %c0_i32_0 : i32
    scf.if %4 {
      %cst = arith.constant 0.000000e+00 : f32
      %8 = vector.broadcast %cst : f32 to vector<1x128x512xf32>
      %c0 = arith.constant 0 : index
      %c0_3 = arith.constant 0 : index
      %c0_4 = arith.constant 0 : index
      %9 = vector.load %arg4[%c0, %c0_3, %c0_4] : memref<1x128x512xf32, #tpu.memory_space<vmem>>, vector<1x128x512xf32>
      tpu.vector_store %arg4[%c0, %c0_3, %c0_4], %8 {strides = array<i32>} : memref<1x128x512xf32, #tpu.memory_space<vmem>>, vector<1x128x512xf32>,
    } else {
    }
    %c0_i32_1 = arith.constant 0 : i32
    %5 = arith.cmpi ne, %1, %c0_i32_1 : i32
    %6 = arith.extui %5 : i1 to i32
    %c0_i32_2 = arith.constant 0 : i32
    %7 = arith.cmpi ne, %6, %c0_i32_2 : i32
    scf.if %7 {
      %c0 = arith.constant 0 : index
      %c0_3 = arith.constant 0 : index
      %c0_4 = arith.constant 0 : index
      %8 = vector.load %arg3[%c0, %c0_3, %c0_4] : memref<1x128x512xf32, #tpu.memory_space<vmem>>, vector<1x128x512xf32>
      %cst = arith.constant 1.42857146 : f32
      %9 = vector.broadcast %cst : f32 to vector<1x128x512xf32>
      %10 = arith.mulf %8, %9 : vector<1x128x512xf32>
      %c0_5 = arith.constant 0 : index
      %c0_6 = arith.constant 0 : index
      %c0_7 = arith.constant 0 : index
      %11 = vector.load %arg4[%c0_5, %c0_6, %c0_7] : memref<1x128x512xf32, #tpu.memory_space<vmem>>, vector<1x128x512xf32>
      tpu.vector_store %arg4[%c0_5, %c0_6, %c0_7], %10 {strides = array<i32>} : memref<1x128x512xf32, #tpu.memory_space<vmem>>, vector<1x128x512xf32>,
    } else {
    }
    return
  }
  func.func @transform_0(%arg0: i32, %arg1: i32, %arg2: memref<2xi32, #tpu.memory_space<smem>>) -> (i32, i32, i32) {
    %0 = arith.index_cast %arg0 : i32 to index
    %1 = memref.load %arg2[%0] : memref<2xi32, #tpu.memory_space<smem>>
    %2 = arith.muli %arg1, %1 : i32
    %c0_i32 = arith.constant 0 : i32
    %c0_i32_0 = arith.constant 0 : i32
    return %arg0, %2, %c0_i32 : i32, i32, i32
  }
  func.func @transform_1(%arg0: i32, %arg1: i32, %arg2: memref<2xi32, #tpu.memory_space<smem>>) -> (i32, i32, i32) {
    %c0_i32 = arith.constant 0 : i32
    %c0_i32_0 = arith.constant 0 : i32
    return %arg0, %arg1, %c0_i32 : i32, i32, i32
  }
}

</mosaic_0001>

<bundles_post_ra>
// kernel: tpu_custom_call.1
= control target key start
LH: loop header
LB: loop body
LE: loop exit
PB: predicated region body
PF: predicated region fallthrough
CT: control target
= control target key end

     0   :  { %s859_s9 = smov [#allocation3]   ;;  %s1390_s0 = inlined_call_operand.hbm [shape: s32[2], index: 0, kind: input, shape index: {}]   ;;  %s1391_s1 = inlined_call_operand.hbm [shape: f32[2,520,512], index: 1, kind: input, shape index: {}]   ;;  %s1392_s2 = inlined_call_operand.hbm [shape: f32[2,520,512], index: 2, kind: output, shape index: {}]  }
   0x1   :  { %8 = dma.hbm_to_smem %s1390_s0, 16, %s859_s9, [#allocation2] }
   0x2   :  { %805 = dma.done.wait [#allocation2], 16 }
   0x3   :  { %806 = vsyncadd [#allocation2], 4294967280 }
   0x4   :  { %10 = sfence }
   0x5   :  { %11 = vsyncpa [#allocation5], 0 }
   0x6   :  { %13 = vsyncpa [#allocation5 + $0x1], 0 }
   0x7   :  { %14 = vsyncpa [#allocation6], 0 }
   0x8   :  { %16 = vsyncpa [#allocation6 + $0x1], 0  ;;  %s885_s12 = smov 0   ;;  %s887_s13 = smov 0  }
   0x9   :  { %s889_s14 = smov 0   ;;  %s891_s15 = smov 0  }
   0xa   :  { %s893_s16 = smov 0   ;;  %s895_s17 = smov 0  }
   0xb   :  { %s897_s0 = smov 0   ;;  %s899_s18 = smov 0  }
   0xc   :  { %s901_s19 = smov 0   ;;  %s903_s20 = smov 0  }
   0xd   :  { %s905_s21 = smov 0  }
   0xe LB: > { %1396 = sst [smem:[#allocation11_spill]] %s853_s20  ;;  %s565_s22 = sadd.s32 4294967295, %s857_s21   ;;  %s857_s21 = sphi %s905_s21, %s22_s21   ;;  %s853_s20 = sphi %s903_s20, %s1406_s20   ;;  %s849_s19 = sphi %s901_s19, %s1414_s19   ;;  %s845_s18 = sphi %s899_s18, %s1404_s18   ;;  %s841_s0 = sphi %s897_s0, %s1413_s0   ;;  %s837_s17 = sphi %s895_s17, %s1412_s17   ;;  %s833_s16 = sphi %s893_s16, %s1411_s16   ;;  %s829_s15 = sphi %s891_s15, %s1410_s15   ;;  %s825_s14 = sphi %s889_s14, %s1409_s14   ;;  %s821_s13 = sphi %s887_s13, %s1408_s13   ;;  %s817_s12 = sphi %s885_s12, %s1407_s12  }
   0xf   : > { %s31_s23 = sadd.s32 1, %s849_s19  ;;  %s34_s24 = sadd.s32 1, %s853_s20 }
  0x10   : > { %p32_p0 = scmp.ge.s32.totalorder %s31_s23, 5  ;;  %s38_s25 = sld [smem:[#allocation3 + %s853_s20]] }
  0x11   : > { %s566_s26 = sadd.s32 4294967294, %s857_s21   ;;  %p54_p1 = scmp.ne.s32.totalorder %s837_s17, %s833_s16 }
  0x12   : > { %s1416_s23 = smov (%p32_p0, %s31_s23), 0  ;;  %s1418_s24 = smov (!%p32_p0, %s34_s24), %s853_s20 }
  0x13   : > { %1397 = sst [smem:[#allocation12_spill]] %s1416_s23  ;;  %p55_p2 = scmp.eq.s32.totalorder %s857_s21, 0 }
  0x14   : > { %p60_p3 = scmp.ne.s32.totalorder %s833_s16, %s829_s15  ;;  %p36_p4 = scmp.ge.s32.totalorder %s1418_s24, 2 }
  0x15   : > { %p61_p5 = scmp.eq.s32.totalorder %s565_s22, 0  ;;  %p951_p6 = por %p55_p2, %p54_p1 }
  0x16   : > { %s39_s27 = smul.u32 %s849_s19, %s38_s25  ;;  %s1420_s24 = smov (%p36_p4, %s1418_s24), 0 }
  0x17   : > { %1399 = sst [smem:[#allocation13_spill]] %s1420_s24  ;;  %p957_p7 = por %p61_p5, %p60_p3 }
  0x18   : > { %s71_s30 = ssub.s32 %s849_s19, %s1416_s23  ;;  %s40_s3 = sld [smem:[#allocation3 + %s1420_s24]] }
  0x19   : > { %s42_s4 = ssub.s32 %s853_s20, %s1420_s24  ;;  %s75_s6 = sadd.s32 1, %s825_s14 }
  0x1a   : > { %s72_s5 = sor.u32 %s71_s30, %s42_s4  ;;  %p85_p9 = scmp.ne.s32.totalorder %s825_s14, %s821_s13 }
  0x1b   : > { %p73_p8 = scmp.eq.s32.totalorder %s72_s5, 0  ;;  %p86_p10 = scmp.eq.s32.totalorder %s565_s22, 9 }
  0x1c   : > { %p91_p11 = scmp.ne.s32.totalorder %s821_s13, %s817_s12  ;;  %p92_p13 = scmp.eq.s32.totalorder %s566_s26, 9 }
  0x1d   : > { %s972_s7 = scalar_select %p73_p8, %s825_s14, %s75_s6  }
  0x1e   : > { %p974_p12 = por %p86_p10, %p85_p9  ;;  %s41_s9 = smul.u32 %s40_s3, %s1416_s23 }
  0x1f   : > { %p979_p0 = por %p92_p13, %p91_p11  ;;  %s47_s25 = sadd.s32 1, %s837_s17 }
  0x20   : > { %s43_s11 = ssub.s32 %s39_s27, %s41_s9  ;;  %p568_p2 = scmp.ge.s32.totalorder %s857_s21, 10 }
  0x21   : > { %s1402_s10 = scalar_select %p979_p0, 1, 0 }
  0x22   : > { %s44_s15 = sor.u32 %s43_s11, %s42_s4  ;;  %108 = sbr.rel (%p568_p2) target bundleno = 83 (0x53), region = 16 }
  0x23   : > { %p45_p1 = scmp.eq.s32.totalorder %s44_s15, 0 }
  0x25   : > { %s985_s30 = scalar_select %p45_p1, %s837_s17, %s47_s25  }
  0x27   : > { %111 = sbr.rel (!%p951_p6) target bundleno = 83 (0x53), region = 20  ;;  %s112_s22 = sand.u32 (%p951_p6), 1, %s837_s17  }
  0x28   : > { %s117_s26 = sld [smem:[#allocation3 + %s853_s20]] (%p951_p6)  ;;  %s569_s3 = sshll.u32 (%p951_p6), %s112_s22, 9 }
  0x29   : > { %s996_s11 = scalar_lea.sflag (%p951_p6), [#allocation5], %s112_s22  ;;  %s116_s28 = scalar_lea.vmem (%p951_p6), [#allocation4], %s569_s3 }
  0x2e   : > { %s118_s5 = smul.u32 %s849_s19, %s117_s26 }
  0x30   : > { %s570_s6 = sshll.u32 %s118_s5, 4 }
  0x31   : > { %s120_s27 = ssub.s32 65, %s570_s6 }
  0x32   : > { %p121_p3 = scmp.lt.s32.totalorder %s120_s27, 16 }
  0x34   : > { %s1422_s27 = smov (!%p121_p3, %s120_s27), 16 }
  0x35   : > { %s993_s4 = sshll.u32 %s1422_s27, 9 }
  0x36   : > { %s126_s9 = ssub.s32 8192, %s993_s4 }
  0x37   : > { %127 = vsyncadd %s996_s11, %s126_s9  ;;  %p573_p4 = scmp.ne.s32.totalorder %s993_s4, 0  ;;  %s595_s15 = sshll.u32 %s118_s5, 6 }
  0x38   : > { %s598_s25 = smul.u32 260, %s853_s20  ;;  %s135_s26 = sshll.u32 %s116_s28, 4  ;;  %s1001_s26 = int_to_ptr.vmem [resolvable:$true] %s135_s26 }
  0x39   : > { %s713_s28 = scalar_lea.hbm %s1391_s1, 66560 }
  0x3a   : > { %s131_s6 = sadd.s32 %s598_s25, %s595_s15 }
  0x3b   : > { %s575_s27 = sshll.u32 %s131_s6, 7 }
  0x3c   : > { %s1006_s22 = scalar_lea.hbm %s1391_s1, %s575_s27 }
  0x3d   : > { %s709_s3 = scalar_lea.hbm %s1006_s22, %s993_s4  ;;  %p714_p9 = scmp.lt.s32.totalorder %s1006_s22, %s1391_s1 }
  0x3e   : > { %p710_p5 = scmp.ne.s32.totalorder %s1006_s22, %s709_s3  ;;  %p715_p10 = scmp.lt.s32.totalorder %s713_s28, %s709_s3 }
  0x40   : > { %p711_p6 = pnand %p710_p5, %p573_p4  ;;  %p716_p11 = por %p715_p10, %p714_p9 }
  0x42   : > { %p712_p8 = pneg %p711_p6 }
  0x44   : > { %p717_p13 = pnand %p716_p11, %p712_p8 }
  0x46   : > { %720 = shalt.err (!%p717_p13)
}
  0x47   : > { %s721_s23 = scalar_lea.vmem %s1001_s26, %s993_s4  ;;  %s860_s24 = smov [#allocation4]  }
  0x48   : > { %p722_p1 = scmp.ne.s32.totalorder %s1001_s26, %s721_s23  ;;  %s725_s25 = sshll.u32 %s860_s24, 4  ;;  %s726_s25 = int_to_ptr.vmem [resolvable:$false] %s725_s25 }
  0x49   : > { %s727_s6 = scalar_lea.vmem %s726_s25, 16384  ;;  %p728_p5 = scmp.lt.s32.totalorder %s1001_s26, %s726_s25 }
  0x4a   : > { %p723_p2 = pnand %p722_p1, %p573_p4  ;;  %p729_p6 = scmp.lt.s32.totalorder %s727_s6, %s721_s23 }
  0x4c   : > { %p724_p3 = pneg %p723_p2  ;;  %p730_p0 = por %p729_p6, %p728_p5 }
  0x4e   : > { %p731_p9 = pnand %p730_p0, %p724_p3 }
  0x50   : > { %734 = shalt.err (!%p731_p9)
}
  0x51   : > { %s861_s20 = smov 512   ;;  %s862_s27 = smov 32  }
  0x52   : > { %141 = dma.hbm_to_vmem [thread:$0]  (%p573_p4), %s1006_s22, %s993_s4, %s1001_s26, %s996_s11, %s861_s20, %s861_s20, %s862_s27  }
  0x53 PF: > { %p578_p8 = scmp.ge.s32.totalorder %s857_s21, 1  ;;  %p143_p10 = scmp.lt.s32.totalorder %s857_s21, 11 }
  0x55   : > { %p144_p11 = pnand %p578_p8, %p143_p10 }
  0x56   : > { %s149_s3 = sand.u32 (!%p144_p11), 1, %s833_s16  }
  0x57   : > { %147 = sbr.rel (%p144_p11) target bundleno = 225 (0xe1), region = 24  ;;  %s579_s5 = sshll.u32 (!%p144_p11), %s149_s3, 9 }
  0x58   : > { %s150_s9 = scalar_lea.sflag (!%p144_p11), [#allocation5], %s149_s3  ;;  %s1035_s28 = scalar_lea.vmem (!%p144_p11), [#allocation4], %s579_s5 }
  0x5c   : > { %808 = dma.done.wait (%p957_p7), %s150_s9, 8192  }
  0x5d   : > { %810 = vsyncadd (%p957_p7), %s150_s9, 4294959104  ;;  %s169_s4 = sand.u32 1, %s821_s13   ;;  %s1043_s11 = sld [smem:[#allocation3 + %s845_s18]] }
  0x5e   : > { %s580_s26 = sshll.u32 %s169_s4, 9 }
  0x5f   : > { %s1047_s22 = scalar_lea.vmem [#allocation7], %s580_s26 }
  0x63   : > { %p581_p0 = scmp.ne.s32.totalorder %s1043_s11, 0 }
  0x65   : > { %190 = sbr.rel (%p581_p0) target bundleno = 139 (0x8b), region = 32 }
  0x6a   : > { %v863_v0 = vmov 0.0  }
  0x6b   : > { %191 = vst [vmem:[%s1047_s22] sm:$0xff] %v863_v0  ;;  %192 = vst [vmem:[%s1047_s22 + $0x8] sm:$0xff] %v863_v0 }
  0x6c   : > { %193 = vst [vmem:[%s1047_s22 + $0x10] sm:$0xff] %v863_v0  ;;  %194 = vst [vmem:[%s1047_s22 + $0x18] sm:$0xff] %v863_v0 }
  0x6d   : > { %195 = vst [vmem:[%s1047_s22 + $0x20] sm:$0xff] %v863_v0  ;;  %196 = vst [vmem:[%s1047_s22 + $0x28] sm:$0xff] %v863_v0 }
  0x6e   : > { %197 = vst [vmem:[%s1047_s22 + $0x30] sm:$0xff] %v863_v0  ;;  %198 = vst [vmem:[%s1047_s22 + $0x38] sm:$0xff] %v863_v0 }
  0x6f   : > { %199 = vst [vmem:[%s1047_s22 + $0x40] sm:$0xff] %v863_v0  ;;  %200 = vst [vmem:[%s1047_s22 + $0x48] sm:$0xff] %v863_v0 }
  0x70   : > { %201 = vst [vmem:[%s1047_s22 + $0x50] sm:$0xff] %v863_v0  ;;  %202 = vst [vmem:[%s1047_s22 + $0x58] sm:$0xff] %v863_v0 }
  0x71   : > { %203 = vst [vmem:[%s1047_s22 + $0x60] sm:$0xff] %v863_v0  ;;  %204 = vst [vmem:[%s1047_s22 + $0x68] sm:$0xff] %v863_v0 }
  0x72   : > { %205 = vst [vmem:[%s1047_s22 + $0x70] sm:$0xff] %v863_v0  ;;  %206 = vst [vmem:[%s1047_s22 + $0x78] sm:$0xff] %v863_v0 }
  0x73   : > { %207 = vst [vmem:[%s1047_s22 + $0x80] sm:$0xff] %v863_v0  ;;  %208 = vst [vmem:[%s1047_s22 + $0x88] sm:$0xff] %v863_v0 }
  0x74   : > { %209 = vst [vmem:[%s1047_s22 + $0x90] sm:$0xff] %v863_v0  ;;  %210 = vst [vmem:[%s1047_s22 + $0x98] sm:$0xff] %v863_v0 }
  0x75   : > { %211 = vst [vmem:[%s1047_s22 + $0xa0] sm:$0xff] %v863_v0  ;;  %212 = vst [vmem:[%s1047_s22 + $0xa8] sm:$0xff] %v863_v0 }
  0x76   : > { %213 = vst [vmem:[%s1047_s22 + $0xb0] sm:$0xff] %v863_v0  ;;  %214 = vst [vmem:[%s1047_s22 + $0xb8] sm:$0xff] %v863_v0 }
  0x77   : > { %215 = vst [vmem:[%s1047_s22 + $0xc0] sm:$0xff] %v863_v0  ;;  %216 = vst [vmem:[%s1047_s22 + $0xc8] sm:$0xff] %v863_v0 }
  0x78   : > { %217 = vst [vmem:[%s1047_s22 + $0xd0] sm:$0xff] %v863_v0  ;;  %218 = vst [vmem:[%s1047_s22 + $0xd8] sm:$0xff] %v863_v0 }
  0x79   : > { %219 = vst [vmem:[%s1047_s22 + $0xe0] sm:$0xff] %v863_v0  ;;  %220 = vst [vmem:[%s1047_s22 + $0xe8] sm:$0xff] %v863_v0 }
  0x7a   : > { %221 = vst [vmem:[%s1047_s22 + $0xf0] sm:$0xff] %v863_v0  ;;  %222 = vst [vmem:[%s1047_s22 + $0xf8] sm:$0xff] %v863_v0 }
  0x7b   : > { %223 = vst [vmem:[%s1047_s22 + $0x100] sm:$0xff] %v863_v0  ;;  %224 = vst [vmem:[%s1047_s22 + $0x108] sm:$0xff] %v863_v0 }
  0x7c   : > { %225 = vst [vmem:[%s1047_s22 + $0x110] sm:$0xff] %v863_v0  ;;  %226 = vst [vmem:[%s1047_s22 + $0x118] sm:$0xff] %v863_v0 }
  0x7d   : > { %227 = vst [vmem:[%s1047_s22 + $0x120] sm:$0xff] %v863_v0  ;;  %228 = vst [vmem:[%s1047_s22 + $0x128] sm:$0xff] %v863_v0 }
  0x7e   : > { %229 = vst [vmem:[%s1047_s22 + $0x130] sm:$0xff] %v863_v0  ;;  %230 = vst [vmem:[%s1047_s22 + $0x138] sm:$0xff] %v863_v0 }
  0x7f   : > { %231 = vst [vmem:[%s1047_s22 + $0x140] sm:$0xff] %v863_v0  ;;  %232 = vst [vmem:[%s1047_s22 + $0x148] sm:$0xff] %v863_v0 }
  0x80   : > { %233 = vst [vmem:[%s1047_s22 + $0x150] sm:$0xff] %v863_v0  ;;  %234 = vst [vmem:[%s1047_s22 + $0x158] sm:$0xff] %v863_v0 }
  0x81   : > { %235 = vst [vmem:[%s1047_s22 + $0x160] sm:$0xff] %v863_v0  ;;  %236 = vst [vmem:[%s1047_s22 + $0x168] sm:$0xff] %v863_v0 }
  0x82   : > { %237 = vst [vmem:[%s1047_s22 + $0x170] sm:$0xff] %v863_v0  ;;  %238 = vst [vmem:[%s1047_s22 + $0x178] sm:$0xff] %v863_v0 }
  0x83   : > { %239 = vst [vmem:[%s1047_s22 + $0x180] sm:$0xff] %v863_v0  ;;  %240 = vst [vmem:[%s1047_s22 + $0x188] sm:$0xff] %v863_v0 }
  0x84   : > { %241 = vst [vmem:[%s1047_s22 + $0x190] sm:$0xff] %v863_v0  ;;  %242 = vst [vmem:[%s1047_s22 + $0x198] sm:$0xff] %v863_v0 }
  0x85   : > { %243 = vst [vmem:[%s1047_s22 + $0x1a0] sm:$0xff] %v863_v0  ;;  %244 = vst [vmem:[%s1047_s22 + $0x1a8] sm:$0xff] %v863_v0 }
  0x86   : > { %245 = vst [vmem:[%s1047_s22 + $0x1b0] sm:$0xff] %v863_v0  ;;  %246 = vst [vmem:[%s1047_s22 + $0x1b8] sm:$0xff] %v863_v0 }
  0x87   : > { %247 = vst [vmem:[%s1047_s22 + $0x1c0] sm:$0xff] %v863_v0  ;;  %248 = vst [vmem:[%s1047_s22 + $0x1c8] sm:$0xff] %v863_v0 }
  0x88   : > { %249 = vst [vmem:[%s1047_s22 + $0x1d0] sm:$0xff] %v863_v0  ;;  %250 = vst [vmem:[%s1047_s22 + $0x1d8] sm:$0xff] %v863_v0 }
  0x89   : > { %251 = vst [vmem:[%s1047_s22 + $0x1e0] sm:$0xff] %v863_v0  ;;  %252 = vst [vmem:[%s1047_s22 + $0x1e8] sm:$0xff] %v863_v0 }
  0x8a   : > { %253 = vst [vmem:[%s1047_s22 + $0x1f0] sm:$0xff] %v863_v0  ;;  %254 = vst [vmem:[%s1047_s22 + $0x1f8] sm:$0xff] %v863_v0 }
  0x8b PF: > { %p582_p7 = scmp.eq.s32.totalorder %s1043_s11, 0 }
  0x8d   : > { %258 = sbr.rel (%p582_p7) target bundleno = 191 (0xbf), region = 36 }
  0x92   : > { %v259_v1 = vld [vmem:[%s1035_s28] sm:$0xff]  ;;  %v260_v2 = vld [vmem:[%s1035_s28 + $0x8] sm:$0xff]  ;;  %v261_v3 = vld [vmem:[%s1035_s28 + $0x10] sm:$0xff] }
  0x93   : > { %v323_v4 = vmul.f32 1.4285715, %v259_v1  ;;  %v324_v5 = vmul.f32 1.4285715, %v260_v2  ;;  %v325_v6 = vmul.f32 1.4285715, %v261_v3 }
  0x94   : > { %v262_v7 = vld [vmem:[%s1035_s28 + $0x18] sm:$0xff]  ;;  %v263_v8 = vld [vmem:[%s1035_s28 + $0x20] sm:$0xff]  ;;  %v264_v9 = vld [vmem:[%s1035_s28 + $0x28] sm:$0xff] }
  0x95   : > { %387 = vst [vmem:[%s1047_s22] sm:$0xff] %v323_v4  ;;  %388 = vst [vmem:[%s1047_s22 + $0x8] sm:$0xff] %v324_v5  ;;  %v326_v10 = vmul.f32 1.4285715, %v262_v7  ;;  %v327_v11 = vmul.f32 1.4285715, %v263_v8  ;;  %v265_v13 = vld [vmem:[%s1035_s28 + $0x30] sm:$0xff] }
  0x96   : > { %389 = vst [vmem:[%s1047_s22 + $0x10] sm:$0xff] %v325_v6  ;;  %v328_v12 = vmul.f32 1.4285715, %v264_v9  ;;  %v266_v14 = vld [vmem:[%s1035_s28 + $0x38] sm:$0xff]  ;;  %v267_v15 = vld [vmem:[%s1035_s28 + $0x40] sm:$0xff]  ;;  %v268_v19 = vld [vmem:[%s1035_s28 + $0x48] sm:$0xff] }
  0x97   : > { %390 = vst [vmem:[%s1047_s22 + $0x18] sm:$0xff] %v326_v10  ;;  %391 = vst [vmem:[%s1047_s22 + $0x20] sm:$0xff] %v327_v11  ;;  %v329_v16 = vmul.f32 1.4285715, %v265_v13  ;;  %v330_v17 = vmul.f32 1.4285715, %v266_v14 }
  0x98   : > { %392 = vst [vmem:[%s1047_s22 + $0x28] sm:$0xff] %v328_v12  ;;  %v331_v18 = vmul.f32 1.4285715, %v267_v15  ;;  %v269_v20 = vld [vmem:[%s1035_s28 + $0x50] sm:$0xff]  ;;  %v270_v21 = vld [vmem:[%s1035_s28 + $0x58] sm:$0xff]  ;;  %v271_v25 = vld [vmem:[%s1035_s28 + $0x60] sm:$0xff] }
  0x99   : > { %393 = vst [vmem:[%s1047_s22 + $0x30] sm:$0xff] %v329_v16  ;;  %394 = vst [vmem:[%s1047_s22 + $0x38] sm:$0xff] %v330_v17  ;;  %v332_v22 = vmul.f32 1.4285715, %v268_v19  ;;  %v333_v23 = vmul.f32 1.4285715, %v269_v20 }
  0x9a   : > { %395 = vst [vmem:[%s1047_s22 + $0x40] sm:$0xff] %v331_v18  ;;  %v334_v24 = vmul.f32 1.4285715, %v270_v21  ;;  %v272_v26 = vld [vmem:[%s1035_s28 + $0x68] sm:$0xff]  ;;  %v273_v27 = vld [vmem:[%s1035_s28 + $0x70] sm:$0xff]  ;;  %v274_v31 = vld [vmem:[%s1035_s28 + $0x78] sm:$0xff] }
  0x9b   : > { %396 = vst [vmem:[%s1047_s22 + $0x48] sm:$0xff] %v332_v22  ;;  %397 = vst [vmem:[%s1047_s22 + $0x50] sm:$0xff] %v333_v23  ;;  %v335_v28 = vmul.f32 1.4285715, %v271_v25  ;;  %v336_v29 = vmul.f32 1.4285715, %v272_v26 }
  0x9c   : > { %398 = vst [vmem:[%s1047_s22 + $0x58] sm:$0xff] %v334_v24  ;;  %v337_v30 = vmul.f32 1.4285715, %v273_v27  ;;  %v275_v32 = vld [vmem:[%s1035_s28 + $0x80] sm:$0xff]  ;;  %v276_v33 = vld [vmem:[%s1035_s28 + $0x88] sm:$0xff]  ;;  %v277_v37 = vld [vmem:[%s1035_s28 + $0x90] sm:$0xff] }
  0x9d   : > { %399 = vst [vmem:[%s1047_s22 + $0x60] sm:$0xff] %v335_v28  ;;  %400 = vst [vmem:[%s1047_s22 + $0x68] sm:$0xff] %v336_v29  ;;  %v338_v34 = vmul.f32 1.4285715, %v274_v31  ;;  %v339_v35 = vmul.f32 1.4285715, %v275_v32 }
  0x9e   : > { %401 = vst [vmem:[%s1047_s22 + $0x70] sm:$0xff] %v337_v30  ;;  %v340_v36 = vmul.f32 1.4285715, %v276_v33  ;;  %v278_v38 = vld [vmem:[%s1035_s28 + $0x98] sm:$0xff]  ;;  %v279_v39 = vld [vmem:[%s1035_s28 + $0xa0] sm:$0xff]  ;;  %v280_v43 = vld [vmem:[%s1035_s28 + $0xa8] sm:$0xff] }
  0x9f   : > { %402 = vst [vmem:[%s1047_s22 + $0x78] sm:$0xff] %v338_v34  ;;  %403 = vst [vmem:[%s1047_s22 + $0x80] sm:$0xff] %v339_v35  ;;  %v341_v40 = vmul.f32 1.4285715, %v277_v37  ;;  %v342_v41 = vmul.f32 1.4285715, %v278_v38 }
  0xa0   : > { %404 = vst [vmem:[%s1047_s22 + $0x88] sm:$0xff] %v340_v36  ;;  %v343_v42 = vmul.f32 1.4285715, %v279_v39  ;;  %v281_v44 = vld [vmem:[%s1035_s28 + $0xb0] sm:$0xff]  ;;  %v282_v45 = vld [vmem:[%s1035_s28 + $0xb8] sm:$0xff]  ;;  %v283_v49 = vld [vmem:[%s1035_s28 + $0xc0] sm:$0xff] }
  0xa1   : > { %405 = vst [vmem:[%s1047_s22 + $0x90] sm:$0xff] %v341_v40  ;;  %406 = vst [vmem:[%s1047_s22 + $0x98] sm:$0xff] %v342_v41  ;;  %v344_v46 = vmul.f32 1.4285715, %v280_v43  ;;  %v345_v47 = vmul.f32 1.4285715, %v281_v44 }
  0xa2   : > { %407 = vst [vmem:[%s1047_s22 + $0xa0] sm:$0xff] %v343_v42  ;;  %v346_v48 = vmul.f32 1.4285715, %v282_v45  ;;  %v284_v50 = vld [vmem:[%s1035_s28 + $0xc8] sm:$0xff]  ;;  %v285_v51 = vld [vmem:[%s1035_s28 + $0xd0] sm:$0xff]  ;;  %v286_v55 = vld [vmem:[%s1035_s28 + $0xd8] sm:$0xff] }
  0xa3   : > { %408 = vst [vmem:[%s1047_s22 + $0xa8] sm:$0xff] %v344_v46  ;;  %409 = vst [vmem:[%s1047_s22 + $0xb0] sm:$0xff] %v345_v47  ;;  %v347_v52 = vmul.f32 1.4285715, %v283_v49  ;;  %v348_v53 = vmul.f32 1.4285715, %v284_v50 }
  0xa4   : > { %410 = vst [vmem:[%s1047_s22 + $0xb8] sm:$0xff] %v346_v48  ;;  %v349_v54 = vmul.f32 1.4285715, %v285_v51  ;;  %v287_v56 = vld [vmem:[%s1035_s28 + $0xe0] sm:$0xff]  ;;  %v288_v57 = vld [vmem:[%s1035_s28 + $0xe8] sm:$0xff]  ;;  %v289_v61 = vld [vmem:[%s1035_s28 + $0xf0] sm:$0xff] }
  0xa5   : > { %411 = vst [vmem:[%s1047_s22 + $0xc0] sm:$0xff] %v347_v52  ;;  %412 = vst [vmem:[%s1047_s22 + $0xc8] sm:$0xff] %v348_v53  ;;  %v350_v58 = vmul.f32 1.4285715, %v286_v55  ;;  %v351_v59 = vmul.f32 1.4285715, %v287_v56 }
  0xa6   : > { %413 = vst [vmem:[%s1047_s22 + $0xd0] sm:$0xff] %v349_v54  ;;  %v352_v60 = vmul.f32 1.4285715, %v288_v57  ;;  %v290_v62 = vld [vmem:[%s1035_s28 + $0xf8] sm:$0xff]  ;;  %v291_v63 = vld [vmem:[%s1035_s28 + $0x100] sm:$0xff]  ;;  %v292_v3 = vld [vmem:[%s1035_s28 + $0x108] sm:$0xff] }
  0xa7   : > { %414 = vst [vmem:[%s1047_s22 + $0xd8] sm:$0xff] %v350_v58  ;;  %415 = vst [vmem:[%s1047_s22 + $0xe0] sm:$0xff] %v351_v59  ;;  %v353_v0 = vmul.f32 1.4285715, %v289_v61  ;;  %v354_v1 = vmul.f32 1.4285715, %v290_v62 }
  0xa8   : > { %416 = vst [vmem:[%s1047_s22 + $0xe8] sm:$0xff] %v352_v60  ;;  %v355_v2 = vmul.f32 1.4285715, %v291_v63  ;;  %v293_v4 = vld [vmem:[%s1035_s28 + $0x110] sm:$0xff]  ;;  %v294_v5 = vld [vmem:[%s1035_s28 + $0x118] sm:$0xff]  ;;  %v295_v9 = vld [vmem:[%s1035_s28 + $0x120] sm:$0xff] }
  0xa9   : > { %417 = vst [vmem:[%s1047_s22 + $0xf0] sm:$0xff] %v353_v0  ;;  %418 = vst [vmem:[%s1047_s22 + $0xf8] sm:$0xff] %v354_v1  ;;  %v356_v6 = vmul.f32 1.4285715, %v292_v3  ;;  %v357_v7 = vmul.f32 1.4285715, %v293_v4 }
  0xaa   : > { %419 = vst [vmem:[%s1047_s22 + $0x100] sm:$0xff] %v355_v2  ;;  %v358_v8 = vmul.f32 1.4285715, %v294_v5  ;;  %v296_v10 = vld [vmem:[%s1035_s28 + $0x128] sm:$0xff]  ;;  %v297_v11 = vld [vmem:[%s1035_s28 + $0x130] sm:$0xff]  ;;  %v298_v15 = vld [vmem:[%s1035_s28 + $0x138] sm:$0xff] }
  0xab   : > { %420 = vst [vmem:[%s1047_s22 + $0x108] sm:$0xff] %v356_v6  ;;  %421 = vst [vmem:[%s1047_s22 + $0x110] sm:$0xff] %v357_v7  ;;  %v359_v12 = vmul.f32 1.4285715, %v295_v9  ;;  %v360_v13 = vmul.f32 1.4285715, %v296_v10 }
  0xac   : > { %422 = vst [vmem:[%s1047_s22 + $0x118] sm:$0xff] %v358_v8  ;;  %v361_v14 = vmul.f32 1.4285715, %v297_v11  ;;  %v299_v16 = vld [vmem:[%s1035_s28 + $0x140] sm:$0xff]  ;;  %v300_v17 = vld [vmem:[%s1035_s28 + $0x148] sm:$0xff]  ;;  %v301_v21 = vld [vmem:[%s1035_s28 + $0x150] sm:$0xff] }
  0xad   : > { %423 = vst [vmem:[%s1047_s22 + $0x120] sm:$0xff] %v359_v12  ;;  %424 = vst [vmem:[%s1047_s22 + $0x128] sm:$0xff] %v360_v13  ;;  %v362_v18 = vmul.f32 1.4285715, %v298_v15  ;;  %v363_v19 = vmul.f32 1.4285715, %v299_v16 }
  0xae   : > { %425 = vst [vmem:[%s1047_s22 + $0x130] sm:$0xff] %v361_v14  ;;  %v364_v20 = vmul.f32 1.4285715, %v300_v17  ;;  %v302_v22 = vld [vmem:[%s1035_s28 + $0x158] sm:$0xff]  ;;  %v303_v23 = vld [vmem:[%s1035_s28 + $0x160] sm:$0xff]  ;;  %v304_v27 = vld [vmem:[%s1035_s28 + $0x168] sm:$0xff] }
  0xaf   : > { %426 = vst [vmem:[%s1047_s22 + $0x138] sm:$0xff] %v362_v18  ;;  %427 = vst [vmem:[%s1047_s22 + $0x140] sm:$0xff] %v363_v19  ;;  %v365_v24 = vmul.f32 1.4285715, %v301_v21  ;;  %v366_v25 = vmul.f32 1.4285715, %v302_v22 }
  0xb0   : > { %428 = vst [vmem:[%s1047_s22 + $0x148] sm:$0xff] %v364_v20  ;;  %v367_v26 = vmul.f32 1.4285715, %v303_v23  ;;  %v305_v28 = vld [vmem:[%s1035_s28 + $0x170] sm:$0xff]  ;;  %v306_v29 = vld [vmem:[%s1035_s28 + $0x178] sm:$0xff]  ;;  %v307_v33 = vld [vmem:[%s1035_s28 + $0x180] sm:$0xff] }
  0xb1   : > { %429 = vst [vmem:[%s1047_s22 + $0x150] sm:$0xff] %v365_v24  ;;  %430 = vst [vmem:[%s1047_s22 + $0x158] sm:$0xff] %v366_v25  ;;  %v368_v30 = vmul.f32 1.4285715, %v304_v27  ;;  %v369_v31 = vmul.f32 1.4285715, %v305_v28 }
  0xb2   : > { %431 = vst [vmem:[%s1047_s22 + $0x160] sm:$0xff] %v367_v26  ;;  %v370_v32 = vmul.f32 1.4285715, %v306_v29  ;;  %v308_v34 = vld [vmem:[%s1035_s28 + $0x188] sm:$0xff]  ;;  %v309_v35 = vld [vmem:[%s1035_s28 + $0x190] sm:$0xff]  ;;  %v310_v39 = vld [vmem:[%s1035_s28 + $0x198] sm:$0xff] }
  0xb3   : > { %432 = vst [vmem:[%s1047_s22 + $0x168] sm:$0xff] %v368_v30  ;;  %433 = vst [vmem:[%s1047_s22 + $0x170] sm:$0xff] %v369_v31  ;;  %v371_v36 = vmul.f32 1.4285715, %v307_v33  ;;  %v372_v37 = vmul.f32 1.4285715, %v308_v34 }
  0xb4   : > { %434 = vst [vmem:[%s1047_s22 + $0x178] sm:$0xff] %v370_v32  ;;  %v373_v38 = vmul.f32 1.4285715, %v309_v35  ;;  %v311_v40 = vld [vmem:[%s1035_s28 + $0x1a0] sm:$0xff]  ;;  %v312_v41 = vld [vmem:[%s1035_s28 + $0x1a8] sm:$0xff]  ;;  %v313_v45 = vld [vmem:[%s1035_s28 + $0x1b0] sm:$0xff] }
  0xb5   : > { %435 = vst [vmem:[%s1047_s22 + $0x180] sm:$0xff] %v371_v36  ;;  %436 = vst [vmem:[%s1047_s22 + $0x188] sm:$0xff] %v372_v37  ;;  %v374_v42 = vmul.f32 1.4285715, %v310_v39  ;;  %v375_v43 = vmul.f32 1.4285715, %v311_v40 }
  0xb6   : > { %437 = vst [vmem:[%s1047_s22 + $0x190] sm:$0xff] %v373_v38  ;;  %v376_v44 = vmul.f32 1.4285715, %v312_v41  ;;  %v314_v46 = vld [vmem:[%s1035_s28 + $0x1b8] sm:$0xff]  ;;  %v315_v47 = vld [vmem:[%s1035_s28 + $0x1c0] sm:$0xff]  ;;  %v316_v51 = vld [vmem:[%s1035_s28 + $0x1c8] sm:$0xff] }
  0xb7   : > { %438 = vst [vmem:[%s1047_s22 + $0x198] sm:$0xff] %v374_v42  ;;  %439 = vst [vmem:[%s1047_s22 + $0x1a0] sm:$0xff] %v375_v43  ;;  %v377_v48 = vmul.f32 1.4285715, %v313_v45  ;;  %v378_v49 = vmul.f32 1.4285715, %v314_v46 }
  0xb8   : > { %440 = vst [vmem:[%s1047_s22 + $0x1a8] sm:$0xff] %v376_v44  ;;  %v379_v50 = vmul.f32 1.4285715, %v315_v47  ;;  %v317_v52 = vld [vmem:[%s1035_s28 + $0x1d0] sm:$0xff]  ;;  %v318_v53 = vld [vmem:[%s1035_s28 + $0x1d8] sm:$0xff]  ;;  %v319_v57 = vld [vmem:[%s1035_s28 + $0x1e0] sm:$0xff] }
  0xb9   : > { %441 = vst [vmem:[%s1047_s22 + $0x1b0] sm:$0xff] %v377_v48  ;;  %442 = vst [vmem:[%s1047_s22 + $0x1b8] sm:$0xff] %v378_v49  ;;  %v380_v54 = vmul.f32 1.4285715, %v316_v51  ;;  %v381_v55 = vmul.f32 1.4285715, %v317_v52 }
  0xba   : > { %443 = vst [vmem:[%s1047_s22 + $0x1c0] sm:$0xff] %v379_v50  ;;  %v382_v56 = vmul.f32 1.4285715, %v318_v53  ;;  %v320_v58 = vld [vmem:[%s1035_s28 + $0x1e8] sm:$0xff]  ;;  %v321_v59 = vld [vmem:[%s1035_s28 + $0x1f0] sm:$0xff]  ;;  %v322_v63 = vld [vmem:[%s1035_s28 + $0x1f8] sm:$0xff] }
  0xbb   : > { %444 = vst [vmem:[%s1047_s22 + $0x1c8] sm:$0xff] %v380_v54  ;;  %445 = vst [vmem:[%s1047_s22 + $0x1d0] sm:$0xff] %v381_v55  ;;  %v383_v60 = vmul.f32 1.4285715, %v319_v57  ;;  %v384_v61 = vmul.f32 1.4285715, %v320_v58 }
  0xbc   : > { %446 = vst [vmem:[%s1047_s22 + $0x1d8] sm:$0xff] %v382_v56  ;;  %v385_v62 = vmul.f32 1.4285715, %v321_v59  ;;  %v386_v0 = vmul.f32 1.4285715, %v322_v63 }
  0xbd   : > { %447 = vst [vmem:[%s1047_s22 + $0x1e0] sm:$0xff] %v383_v60  ;;  %448 = vst [vmem:[%s1047_s22 + $0x1e8] sm:$0xff] %v384_v61 }
  0xbe   : > { %449 = vst [vmem:[%s1047_s22 + $0x1f0] sm:$0xff] %v385_v62  ;;  %450 = vst [vmem:[%s1047_s22 + $0x1f8] sm:$0xff] %v386_v0 }
  0xbf PF: > { %s1309_s29 = scalar_lea.sflag [#allocation6], %s169_s4  ;;  %458 = sbr.rel (!%p974_p12) target bundleno = 225 (0xe1), region = 40 }
  0xc0   : > { %s584_s15 = sshll.u32 (%p974_p12), %s841_s0, 4 }
  0xc1   : > { %s460_s23 = ssub.s32 (%p974_p12), 65, %s584_s15 }
  0xc2   : > { %p461_p4 = scmp.lt.s32.totalorder (%p974_p12), %s460_s23, 16 }
  0xc4   : > { %s1424_s23 = smov (!%p461_p4, %s460_s23), 16 }
  0xc5   : > { %s1314_s24 = sshll.u32 %s1424_s23, 9 }
  0xc6   : > { %s466_s25 = ssub.s32 8192, %s1314_s24 }
  0xc7   : > { %467 = vsyncadd %s1309_s29, %s466_s25  ;;  %p587_p13 = scmp.ne.s32.totalorder %s1314_s24, 0  ;;  %s597_s8 = sshll.u32 %s841_s0, 6 }
  0xc8   : > { %s599_s6 = smul.u32 260, %s845_s18  ;;  %s475_s20 = sshll.u32 %s1047_s22, 4  ;;  %s1322_s20 = int_to_ptr.vmem [resolvable:$true] %s475_s20 }
  0xc9   : > { %s735_s4 = scalar_lea.vmem %s1322_s20, %s1314_s24  ;;  %s864_s0 = smov [#allocation7]  }
  0xca   : > { %s471_s27 = sadd.s32 %s599_s6, %s597_s8  ;;  %p736_p12 = scmp.ne.s32.totalorder %s1322_s20, %s735_s4 }
  0xcb   : > { %s589_s3 = sshll.u32 %s471_s27, 7  ;;  %s739_s18 = sshll.u32 %s864_s0, 4  ;;  %s740_s18 = int_to_ptr.vmem [resolvable:$false] %s739_s18 }
  0xcc   : > { %s1327_s28 = scalar_lea.hbm %s1392_s2, %s589_s3  ;;  %p737_p1 = pnand %p736_p12, %p587_p13 }
  0xcd   : > { %s741_s11 = scalar_lea.vmem %s740_s18, 16384  ;;  %p742_p3 = scmp.lt.s32.totalorder %s1322_s20, %s740_s18 }
  0xce   : > { %p738_p2 = pneg %p737_p1  ;;  %p743_p5 = scmp.lt.s32.totalorder %s741_s11, %s735_s4 }
  0xd0   : > { %p744_p6 = por %p743_p5, %p742_p3 }
  0xd2   : > { %p745_p9 = pnand %p744_p6, %p738_p2 }
  0xd4   : > { %748 = shalt.err (!%p745_p9)
}
  0xd5   : > { %s749_s26 = scalar_lea.hbm %s1327_s28, %s1314_s24  ;;  %s753_s23 = scalar_lea.hbm %s1392_s2, 66560 }
  0xd6   : > { %p750_p8 = scmp.ne.s32.totalorder %s1327_s28, %s749_s26  ;;  %p754_p0 = scmp.lt.s32.totalorder %s1327_s28, %s1392_s2 }
  0xd7   : > { %p755_p7 = scmp.lt.s32.totalorder %s753_s23, %s749_s26 }
  0xd8   : > { %p751_p10 = pnand %p750_p8, %p587_p13 }
  0xd9   : > { %p756_p4 = por %p755_p7, %p754_p0 }
  0xda   : > { %p752_p11 = pneg %p751_p10 }
  0xdc   : > { %p757_p12 = pnand %p756_p4, %p752_p11 }
  0xde   : > { %760 = shalt.err (!%p757_p12)
}
  0xdf   : > { %s865_s6 = smov 512   ;;  %s866_s27 = smov 32  }
  0xe0   : > { %481 = dma.vmem_to_hbm [thread:$0]  (%p587_p13), %s1322_s20, %s1314_s24, %s1327_s28, %s1309_s29, %s865_s6, %s865_s6, %s866_s27  }
  0xe1 PF: > { %p606_p1 = scmp.ge.s32.totalorder %s857_s21, 2  ;;  %s490_s3 = sand.u32 1, %s817_s12  }
  0xe2   : > { %p1403_p2 = scmp.ne.s32.totalorder %s1402_s10, 0  ;;  %s491_s5 = scalar_lea.sflag [#allocation6], %s490_s3 }
  0xe4   : > { %p603_p3 = pnand %p606_p1, %p1403_p2 }
  0xe6   : > { %p604_p5 = pneg %p603_p3 }
  0xe8   : > { %812 = dma.done.wait (%p604_p5), %s491_s5, 8192  }
  0xe9   : > { %814 = vsyncadd (%p604_p5), %s491_s5, 4294959104  ;;  %s22_s21 = sadd.s32 1, %s857_s21   ;;  %s1404_s18 = sld [smem:[#allocation11_spill]] }
  0xea   : > { %p19_p6 = scmp.ge.s32.totalorder %s22_s21, 12   ;;  %s1405_s29 = sld [smem:[#allocation12_spill]] }
  0xeb   : > { %s1406_s20 = sld [smem:[#allocation13_spill]]  ;;  %s1407_s12 = smov %s821_s13 }
  0xec   : > { %s1408_s13 = smov %s825_s14  ;;  %s1409_s14 = smov %s972_s7 }
  0xed   : > { %s1410_s15 = smov %s833_s16  ;;  %s1411_s16 = smov %s837_s17 }
  0xee   : > { %s1412_s17 = smov %s985_s30  ;;  %s1413_s0 = smov %s849_s19 }
  0xef   :  { %21 = sbr.rel (!%p19_p6) target bundleno = 14 (0xe), region = 77 }
  0xf0   : > { %s1414_s19 = smov %s1405_s29 }
  0xf4   :  { %496 = vsyncpa [#allocation5], 1 }
  0xf5   :  { %498 = vsyncpa [#allocation5 + $0x1], 1 }
  0xf6   :  { %499 = vsyncpa [#allocation6], 1 }
  0xf7   :  { %501 = vsyncpa [#allocation6 + $0x1], 1 }

</bundles_post_ra>
